<compile_context>
chip_gen: v5e
topology: v5e:2x2
jax: 0.10.0
libtpu: 0.0.40
codegen_flags: <defaults>
</compile_context>

<pallas_src>
import jax
import jax.numpy as jnp
from jax.experimental import pallas as pl
from jax.experimental.pallas import tpu as pltpu


def _round_up(x, m):
    return ((x + m - 1) // m) * m


def _make_kernel(dim_pad):
    def fungen_kernel(x_ref, w_cat_ref, b_cat_ref, w_exp_ref, b_exp_ref, o_ref):
        x = x_ref[...]                                           # (tm, dim_pad)

        # Fused: [z_log | y_linear] = x @ [W_log | W_lin] + [b_log | b_lin]
        # W_log first -> the slice feeding the second MXU push is lane-aligned.
        zcat = jnp.dot(x, w_cat_ref[...],
                       preferred_element_type=jnp.float32) + b_cat_ref[...]
        z_log = zcat[:, :dim_pad]                                # (tm, dim_pad)
        y_linear = zcat[:, dim_pad:]                             # (tm, out_pad)

        # exp(log(relu(z)+eps)) == relu(z)+eps; eps is folded into b_exp'.
        y_relu = jnp.maximum(z_log, 0.0).astype(w_exp_ref.dtype)

        y_log = jnp.dot(y_relu, w_exp_ref[...],
                        preferred_element_type=jnp.float32) + b_exp_ref[...]

        o_ref[...] = (y_linear * y_log).astype(o_ref.dtype)

    return fungen_kernel


def prepare_fungen_params(w_lin, b_lin, w_log, b_log, w_exp, b_exp, *,
                          use_bf16=True):
    """One-time weight prep (do this once, outside the per-step call).

    Weights are given as (in, out) [already transposed]; biases (1, out).
    Returns lane-padded, fused, dtype-cast parameters.
    """
    dim, out_dim = w_lin.shape
    dim_pad = _round_up(dim, 128)
    out_pad = _round_up(out_dim, 128)
    mm_dtype = jnp.bfloat16 if use_bf16 else jnp.float32

    def pad2(a, r, c):
        return jnp.pad(a, ((0, r - a.shape[0]), (0, c - a.shape[1])))

    # epsilon fold: relu(z)+eps feeding W_exp  ==  relu(z)@W_exp + eps*colsum.
    b_exp_eff = b_exp + 1e-6 * jnp.sum(w_exp, axis=0, keepdims=True)

    w_cat = jnp.concatenate(
        [pad2(w_log, dim_pad, dim_pad), pad2(w_lin, dim_pad, out_pad)], axis=1)
    b_cat = jnp.concatenate(
        [pad2(b_log, 1, dim_pad), pad2(b_lin, 1, out_pad)], axis=1)

    return dict(
        w_cat=w_cat.astype(mm_dtype),                 # (dim_pad, dim_pad+out_pad)
        b_cat=b_cat.astype(jnp.float32),              # added to f32 accumulator
        w_exp=pad2(w_exp, dim_pad, out_pad).astype(mm_dtype),
        b_exp=pad2(b_exp_eff, 1, out_pad).astype(jnp.float32),
        dim=dim, out_dim=out_dim, dim_pad=dim_pad, out_pad=out_pad,
        mm_dtype=mm_dtype,
    )


def fungen(x, params, *, tm=None, out_dtype=None, target_grid_steps=8):
    """x: (M, dim).  params from prepare_fungen_params.  Returns (M, out_dim)."""
    M, dim = x.shape
    assert dim == params["dim"], "feature dim mismatch"
    dim_pad, out_pad = params["dim_pad"], params["out_pad"]
    out_dim = params["out_dim"]
    mm_dtype = params["mm_dtype"]
    out_dtype = out_dtype if out_dtype is not None else x.dtype

    elem = jnp.dtype(mm_dtype).itemsize
    out_elem = jnp.dtype(out_dtype).itemsize

    # --- VMEM budget from the actual device (64 MiB/TC on v7x, 128 MiB v5e/v6e)
    try:
        vmem_cap = int(pltpu.get_tpu_info().vmem_capacity_bytes)
    except Exception:
        vmem_cap = 64 * 1024 * 1024
    vmem_budget = int(vmem_cap * 0.75)          # headroom below physical VMEM

    # Weight footprint (default BlockSpec pipeline double-buffers even
    # constant-index blocks, so budget x2).
    weight_bytes = (2 * elem * (dim_pad * (dim_pad + out_pad) + dim_pad * out_pad)
                    + 2 * 4 * (dim_pad + 2 * out_pad))

    def tile_bytes(rows):
        io = 2 * rows * (elem * dim_pad + out_elem * out_pad)   # dbl-buffered x/out
        tmp = 4 * rows * (dim_pad + 2 * out_pad)                # f32 zcat / y_log temps
        return io + tmp

    # --- row tile: aim for >= target_grid_steps grid steps, cap by VMEM budget
    row_align = 16 if mm_dtype == jnp.bfloat16 else 8
    if tm is None:
        tm = min(512, _round_up(pl.cdiv(M, target_grid_steps), row_align))
        tm = max(tm, row_align)
        while tm > row_align and weight_bytes + tile_bytes(tm) > vmem_budget:
            tm = _round_up(tm // 2, row_align)
    tm = max(row_align, _round_up(min(tm, _round_up(M, row_align)), row_align))

    M_pad = _round_up(M, tm)                     # ragged M handled by padding
    grid = (M_pad // tm,)

    x_p = x.astype(mm_dtype)
    if M_pad != M or dim_pad != dim:
        x_p = jnp.pad(x_p, ((0, M_pad - M), (0, dim_pad - dim)))

    vmem_limit = int(min(vmem_budget, weight_bytes + tile_bytes(tm) + (4 << 20)))
    vmem_limit = max(vmem_limit, 8 << 20)

    cost = pl.CostEstimate(
        flops=2 * M_pad * dim_pad * (dim_pad + 2 * out_pad),
        transcendentals=0,
        bytes_accessed=int(M_pad * dim_pad * elem + weight_bytes // 2
                           + M_pad * out_pad * out_elem),
    )

    full = lambda i: (0, 0)
    rows = lambda i: (i, 0)

    y_pad = pl.pallas_call(
        _make_kernel(dim_pad),
        out_shape=jax.ShapeDtypeStruct((M_pad, out_pad), out_dtype),
        grid_spec=pltpu.PrefetchScalarGridSpec(
            num_scalar_prefetch=0,
            grid=grid,
            in_specs=[
                pl.BlockSpec((tm, dim_pad), rows),               # x rows
                pl.BlockSpec((dim_pad, dim_pad + out_pad), full),  # [W_log | W_lin]
                pl.BlockSpec((1, dim_pad + out_pad), full),        # [b_log | b_lin]
                pl.BlockSpec((dim_pad, out_pad), full),            # W_exp
                pl.BlockSpec((1, out_pad), full),                  # b_exp + eps fold
            ],
            out_specs=pl.BlockSpec((tm, out_pad), rows),
        ),
        compiler_params=pltpu.CompilerParams(
            dimension_semantics=("parallel",),
            vmem_limit_bytes=vmem_limit),
        cost_estimate=cost,
    )(x_p, params["w_cat"], params["b_cat"], params["w_exp"], params["b_exp"])

    return y_pad[:M, :out_dim]


def fungen_ref(x, w_lin, b_lin, w_log, b_log, w_exp, b_exp):
    """Pure-JAX reference following the original PyTorch formula exactly."""
    y_linear = x @ w_lin + b_lin
    log_x = jnp.log(jnp.maximum(x @ w_log + b_log, 0.0) + 1e-6)
    y_log = jnp.exp(log_x) @ w_exp + b_exp
    return y_linear * y_log


if __name__ == "__main__":
    # Small shapes consistent with the module: batch=2, seq=8, dim=32, out_dim=32
    batch, seq, dim, out_dim = 2, 8, 32, 32
    key = jax.random.PRNGKey(0)
    kx, k1, k2, k3, k4, k5, k6 = jax.random.split(key, 7)

    x3 = jax.random.normal(kx, (batch, seq, dim), dtype=jnp.float32)
    x = x3.reshape(batch * seq, dim)

    # torch Linear-style uniform init, stored as (in, out) so the kernel does x @ W.
    bound = 1.0 / jnp.sqrt(dim)
    w_lin = jax.random.uniform(k1, (dim, out_dim), jnp.float32, -bound, bound)
    b_lin = jax.random.uniform(k2, (1, out_dim), jnp.float32, -bound, bound)
    w_log = jax.random.uniform(k3, (dim, dim), jnp.float32, -bound, bound)
    b_log = jax.random.uniform(k4, (1, dim), jnp.float32, -bound, bound)
    w_exp = jax.random.uniform(k5, (dim, out_dim), jnp.float32, -bound, bound)
    b_exp = jax.random.uniform(k6, (1, out_dim), jnp.float32, -bound, bound)

    y_ref = fungen_ref(x, w_lin, b_lin, w_log, b_log, w_exp, b_exp)

    # f32 path: bit-accurate up to the algebraic exp(log(.)) removal (~1 ulp).
    p_f32 = prepare_fungen_params(w_lin, b_lin, w_log, b_log, w_exp, b_exp,
                                  use_bf16=False)
    y_f32 = jax.block_until_ready(fungen(x, p_f32))
    assert y_f32.shape == (batch * seq, out_dim)
    assert jnp.allclose(y_f32, y_ref, atol=1e-4, rtol=1e-4), "f32 mismatch vs ref"

    # bf16 path (default): MXU-native operands, f32 accumulation.
    p_bf16 = prepare_fungen_params(w_lin, b_lin, w_log, b_log, w_exp, b_exp,
                                   use_bf16=True)
    y_bf16 = jax.block_until_ready(fungen(x, p_bf16))
    assert y_bf16.shape == (batch * seq, out_dim)
    assert jnp.allclose(y_bf16, y_ref, atol=5e-2, rtol=5e-2), "bf16 mismatch vs ref"

    # reshape back to (batch, seq, out_dim) as the module would return
    y_out = y_bf16.reshape(batch, seq, out_dim)
    jax.block_until_ready(y_out)
    print("KERNEL_OK")
</pallas_src>

<mosaic_0001>
module attributes {stable_mosaic.version = 11 : i64} {
  func.func @fungen_kernel(%arg0: i32, %arg1: memref<8x128xf32, #tpu.memory_space<vmem>>, %arg2: memref<128x256xf32, #tpu.memory_space<vmem>>, %arg3: memref<1x256xf32, #tpu.memory_space<vmem>>, %arg4: memref<128x128xf32, #tpu.memory_space<vmem>>, %arg5: memref<1x128xf32, #tpu.memory_space<vmem>>, %arg6: memref<8x128xf32, #tpu.memory_space<vmem>>) attributes {dimension_semantics = [#tpu.dimension_semantics<parallel>], iteration_bounds = array<i64: 2>, scalar_prefetch = 0 : i64, scratch_operands = 0 : i64, tpu.core_type = #tpu.core_type<tc>, window_params = [{transform_indices = @transform_0, window_bounds = array<i64: 8, 128>}, {pipeline_mode = #tpu.pipeline_mode<synchronous>, transform_indices = @transform_1, window_bounds = array<i64: 128, 256>}, {pipeline_mode = #tpu.pipeline_mode<synchronous>, transform_indices = @transform_2, window_bounds = array<i64: 1, 256>}, {pipeline_mode = #tpu.pipeline_mode<synchronous>, transform_indices = @transform_3, window_bounds = array<i64: 128, 128>}, {pipeline_mode = #tpu.pipeline_mode<synchronous>, transform_indices = @transform_4, window_bounds = array<i64: 1, 128>}, {transform_indices = @transform_5, window_bounds = array<i64: 8, 128>}]} {
    %c0 = arith.constant 0 : index
    %c0_0 = arith.constant 0 : index
    %0 = vector.load %arg1[%c0, %c0_0] : memref<8x128xf32, #tpu.memory_space<vmem>>, vector<8x128xf32>
    %c0_1 = arith.constant 0 : index
    %c0_2 = arith.constant 0 : index
    %1 = vector.load %arg2[%c0_1, %c0_2] : memref<128x256xf32, #tpu.memory_space<vmem>>, vector<128x256xf32>
    %cst = arith.constant dense<0.000000e+00> : vector<8x256xf32>
    %2 = tpu.matmul %0, %1, %cst {dimension_numbers = #tpu.dot_dimension_numbers<[1], [0], [0], [1], [0, 0, 1, 1], [], []>} : vector<8x128xf32>, vector<128x256xf32>, vector<8x256xf32> -> vector<8x256xf32>
    %c0_3 = arith.constant 0 : index
    %c0_4 = arith.constant 0 : index
    %3 = vector.load %arg3[%c0_3, %c0_4] : memref<1x256xf32, #tpu.memory_space<vmem>>, vector<1x256xf32>
    %4 = vector.broadcast %3 : vector<1x256xf32> to vector<8x256xf32>
    %5 = arith.addf %2, %4 : vector<8x256xf32>
    %6 = vector.extract_strided_slice %5 {offsets = [0, 0], sizes = [8, 128], strides = [1, 1]} : vector<8x256xf32> to vector<8x128xf32>
    %7 = vector.extract_strided_slice %5 {offsets = [0, 128], sizes = [8, 128], strides = [1, 1]} : vector<8x256xf32> to vector<8x128xf32>
    %cst_5 = arith.constant 0.000000e+00 : f32
    %8 = vector.broadcast %cst_5 : f32 to vector<8x128xf32>
    %9 = arith.maximumf %6, %8 : vector<8x128xf32>
    %c0_6 = arith.constant 0 : index
    %c0_7 = arith.constant 0 : index
    %10 = vector.load %arg4[%c0_6, %c0_7] : memref<128x128xf32, #tpu.memory_space<vmem>>, vector<128x128xf32>
    %cst_8 = arith.constant dense<0.000000e+00> : vector<8x128xf32>
    %11 = tpu.matmul %9, %10, %cst_8 {dimension_numbers = #tpu.dot_dimension_numbers<[1], [0], [0], [1], [0, 0, 1, 1], [], []>} : vector<8x128xf32>, vector<128x128xf32>, vector<8x128xf32> -> vector<8x128xf32>
    %c0_9 = arith.constant 0 : index
    %c0_10 = arith.constant 0 : index
    %12 = vector.load %arg5[%c0_9, %c0_10] : memref<1x128xf32, #tpu.memory_space<vmem>>, vector<1x128xf32>
    %13 = vector.broadcast %12 : vector<1x128xf32> to vector<8x128xf32>
    %14 = arith.addf %11, %13 : vector<8x128xf32>
    %15 = arith.mulf %7, %14 : vector<8x128xf32>
    %c0_11 = arith.constant 0 : index
    %c0_12 = arith.constant 0 : index
    %16 = vector.load %arg6[%c0_11, %c0_12] : memref<8x128xf32, #tpu.memory_space<vmem>>, vector<8x128xf32>
    tpu.vector_store %arg6[%c0_11, %c0_12], %15 {strides = array<i32>} : memref<8x128xf32, #tpu.memory_space<vmem>>, vector<8x128xf32>,
    return
  }
  func.func @transform_0(%arg0: i32) -> (i32, i32) {
    %c0_i32 = arith.constant 0 : i32
    %c0_i32_0 = arith.constant 0 : i32
    return %arg0, %c0_i32 : i32, i32
  }
  func.func @transform_1(%arg0: i32) -> (i32, i32) {
    %c0_i32 = arith.constant 0 : i32
    %c0_i32_0 = arith.constant 0 : i32
    %c0_i32_1 = arith.constant 0 : i32
    return %c0_i32, %c0_i32_0 : i32, i32
  }
  func.func @transform_2(%arg0: i32) -> (i32, i32) {
    %c0_i32 = arith.constant 0 : i32
    %c0_i32_0 = arith.constant 0 : i32
    %c0_i32_1 = arith.constant 0 : i32
    return %c0_i32, %c0_i32_0 : i32, i32
  }
  func.func @transform_3(%arg0: i32) -> (i32, i32) {
    %c0_i32 = arith.constant 0 : i32
    %c0_i32_0 = arith.constant 0 : i32
    %c0_i32_1 = arith.constant 0 : i32
    return %c0_i32, %c0_i32_0 : i32, i32
  }
  func.func @transform_4(%arg0: i32) -> (i32, i32) {
    %c0_i32 = arith.constant 0 : i32
    %c0_i32_0 = arith.constant 0 : i32
    %c0_i32_1 = arith.constant 0 : i32
    return %c0_i32, %c0_i32_0 : i32, i32
  }
  func.func @transform_5(%arg0: i32) -> (i32, i32) {
    %c0_i32 = arith.constant 0 : i32
    %c0_i32_0 = arith.constant 0 : i32
    return %arg0, %c0_i32 : i32, i32
  }
}

</mosaic_0001>

<bundles_post_ra>
// kernel: tpu_custom_call.1
= control target key start
LH: loop header
LB: loop body
LE: loop exit
PB: predicated region body
PF: predicated region fallthrough
CT: control target
= control target key end

     0   :  { %10 = vsyncpa [#allocation3], 0  ;;  %s1026_s0 = inlined_call_operand.hbm [shape: f32[16,128], index: 0, kind: input, shape index: {}]   ;;  %s1027_s1 = inlined_call_operand.hbm [shape: f32[128,256], index: 1, kind: input, shape index: {}]   ;;  %s1028_s2 = inlined_call_operand.hbm [shape: f32[1,256], index: 2, kind: input, shape index: {}]   ;;  %s1029_s3 = inlined_call_operand.hbm [shape: f32[128,128], index: 3, kind: input, shape index: {}]   ;;  %s1030_s4 = inlined_call_operand.vmem [shape: f32[1,128], index: 4, kind: input, shape index: {}]   ;;  %s1031_s5 = inlined_call_operand.hbm [shape: f32[16,128], index: 5, kind: output, shape index: {}]  }
   0x1   :  { %12 = vsyncpa [#allocation3 + $0x1], 0 }
   0x2   :  { %13 = vsyncpa [#allocation6], 0 }
   0x3   :  { %14 = vsyncpa [#allocation9], 0 }
   0x4   :  { %15 = vsyncpa [#allocation4], 0 }
   0x5   :  { %17 = vsyncpa [#allocation4 + $0x1], 0  ;;  %s860_s18 = smov 0   ;;  %s862_s19 = smov 0  }
   0x6   :  { %s864_s20 = smov 0   ;;  %s866_s21 = smov 0  }
   0x7 LB: > { %s175_s24 = sshll.u32 %s1027_s1, 4  ;;  %s884_s25 = sadd.s32 4294967295, %s821_s21   ;;  %s821_s21 = sphi %s866_s21, %s1042_s21   ;;  %s817_s20 = sphi %s864_s20, %s1041_s20   ;;  %s813_s19 = sphi %s862_s19, %s1040_s19   ;;  %s809_s18 = sphi %s860_s18, %s1039_s18   ;;  %s176_s24 = int_to_ptr.hbm [resolvable:$true] %s175_s24 }
   0x8   : > { %p528_p0 = scmp.ge.s32.totalorder %s821_s21, 1  ;;  %p44_p1 = scmp.eq.s32.totalorder %s884_s25, 0 }
   0x9   : > { %p164_p2 = scmp.lt.s32.totalorder %s821_s21, 3  ;;  %s823_s27 = smov [#allocation5]  }
   0xa   : > { %s177_s28 = sshll.u32 %s823_s27, 4  ;;  %s190_s6 = sshll.u32 %s1028_s2, 4  ;;  %s178_s28 = int_to_ptr.vmem [resolvable:$true] %s177_s28  ;;  %s191_s6 = int_to_ptr.hbm [resolvable:$true] %s190_s6 }
   0xb   : > { %p889_p3 = pnand %p528_p0, %p164_p2  ;;  %s201_s10 = sshll.u32 %s1029_s3, 4  ;;  %s202_s10 = int_to_ptr.hbm [resolvable:$true] %s201_s10 }
   0xc   : > { %s824_s11 = smov [#allocation7]   ;;  %s825_s13 = smov 256  }
   0xd   : > { %p561_p4 = pneg %p889_p3  ;;  %s192_s12 = sshll.u32 %s824_s11, 4  ;;  %s193_s12 = int_to_ptr.vmem [resolvable:$true] %s192_s12 }
   0xe   : > { %s826_s14 = smov 16   ;;  %s827_s15 = smov [#allocation8]  }
   0xf   : > { %p901_p6 = pnand %p561_p4, %p44_p1  ;;  %s203_s16 = sshll.u32 %s827_s15, 4  ;;  %s204_s16 = int_to_ptr.vmem [resolvable:$true] %s203_s16 }
  0x10   : > { %s828_s17 = smov 128   ;;  %s829_s22 = smov 8  }
  0x11   : > { %564 = dma.hbm_to_vmem [thread:$0]  (!%p901_p6), %s176_s24, 4096, %s178_s28, [#allocation6], %s825_s13, %s825_s13, %s826_s14  }
  0x12   : > { %567 = dma.hbm_to_vmem [thread:$0]  (!%p901_p6), %s191_s6, 32, %s193_s12, [#allocation6]  }
  0x13   : > { %570 = dma.hbm_to_vmem [thread:$0]  (!%p901_p6), %s202_s10, 2048, %s204_s16, [#allocation9], %s828_s17, %s828_s17, %s829_s22  }
  0x14   : > { %s527_s23 = sadd.s32 4294967294, %s821_s21   ;;  %s916_s24 = sadd.s32 1, %s821_s21  }
  0x15   : > { %s30_s27 = sadd.s32 1, %s817_s20  ;;  %s27_s28 = ssub.s32 %s821_s21, %s916_s24 }
  0x16   : > { %p37_p7 = scmp.ne.s32.totalorder %s817_s20, %s813_s19  ;;  %p28_p8 = scmp.eq.s32.totalorder %s27_s28, 0 }
  0x17   : > { %p38_p9 = scmp.eq.s32.totalorder %s821_s21, 0  ;;  %p43_p10 = scmp.ne.s32.totalorder %s813_s19, %s809_s18 }
  0x18   : > { %p151_p11 = scmp.eq.s32.totalorder %s884_s25, 1  ;;  %p157_p0 = scmp.eq.s32.totalorder %s527_s23, 1 }
  0x19   : > { %s928_s29 = scalar_select %p28_p8, %s817_s20, %s30_s27  }
  0x1a   : > { %p932_p12 = por %p44_p1, %p43_p10  ;;  %p936_p13 = por %p151_p11, %p37_p7 }
  0x1b   : > { %p39_p2 = por %p38_p9, %p37_p7  ;;  %s220_s7 = sand.u32 1, %s817_s20  }
  0x1c   : > { %p941_p4 = por %p157_p0, %p43_p10  ;;  %p582_p6 = scmp.lt.s32.totalorder %s821_s21, 2 }
  0x1d   : > { %s533_s9 = sshll.u32 %s220_s7, 3  ;;  %s534_s10 = sshll.u32 %s821_s21, 3 }
  0x1e   : > { %s228_s13 = scalar_lea.hbm %s1026_s0, %s534_s10  ;;  %s224_s15 = scalar_lea.vmem [#allocation2], %s533_s9 }
  0x1f   : > { %s230_s14 = sshll.u32 %s228_s13, 4  ;;  %s232_s16 = sshll.u32 %s224_s15, 4  ;;  %s231_s14 = int_to_ptr.hbm [resolvable:$true] %s230_s14  ;;  %s233_s16 = int_to_ptr.vmem [resolvable:$true] %s232_s16 }
  0x20   : > { %p950_p8 = pnand %p582_p6, %p39_p2  ;;  %s221_s22 = scalar_lea.sflag [#allocation3], %s220_s7 }
  0x21   : > { %s717_s23 = sshra.s32 %s231_s14, 4  ;;  %s724_s9 = scalar_lea.hbm %s1026_s0, 16  ;;  %s718_s23 = int_to_ptr.hbm [resolvable:$true] %s717_s23 }
  0x22   : > { %s719_s27 = scalar_lea.hbm %s718_s23, 8  ;;  %p721_p9 = pneg %p950_p8 }
  0x23   : > { %p720_p7 = scmp.ne.s32.totalorder %s718_s23, %s719_s27  ;;  %p725_p0 = scmp.lt.s32.totalorder %s718_s23, %s1026_s0 }
  0x24   : > { %p726_p2 = scmp.lt.s32.totalorder %s724_s9, %s719_s27 }
  0x25   : > { %p722_p10 = pnand %p721_p9, %p720_p7 }
  0x26   : > { %p727_p6 = por %p726_p2, %p725_p0 }
  0x27   : > { %p723_p11 = pneg %p722_p10 }
  0x29   : > { %p728_p5 = pnand %p727_p6, %p723_p11 }
  0x2b   : > { %731 = shalt.err (!%p728_p5)
}
  0x2c   : > { %574 = dma.hbm_to_vmem [thread:$0]  (!%p950_p8), %s231_s14, 128, %s233_s16, %s221_s22  }
  0x2d   : > { %241 = sbr.rel (%p889_p3) target bundleno = 356 (0x164), region = 40  ;;  %s967_s7 = sand.u32 (!%p889_p3), 1, %s813_s19  }
  0x2e   : > { %s536_s13 = sshll.u32 (!%p889_p3), %s967_s7, 3  ;;  %s244_s15 = scalar_lea.sflag (!%p889_p3), [#allocation3], %s967_s7 }
  0x2f   : > { %s973_s23 = scalar_lea.vmem (!%p889_p3), [#allocation2], %s536_s13 }
  0x32   : > { %792 = dma.done.wait (%p932_p12), %s244_s15, 128  }
  0x33   : > { %794 = vsyncadd (%p932_p12), %s244_s15, 4294967168 }
  0x34   : > { %796 = dma.done.wait (%p44_p1), [#allocation6], 4128  }
  0x35   : > { %798 = vsyncadd (%p44_p1), [#allocation6], 4294963168 }
  0x36   : > { %800 = dma.done.wait (%p44_p1), [#allocation9], 2048  }
  0x37   : > { %802 = vsyncadd (%p44_p1), [#allocation9], 4294965248  ;;  %v321_v0 = vld [vmem:[#allocation5 + $0xf0] sm:$0xff]  ;;  %v319_v1 = vld [vmem:[#allocation5 + $0xe0] sm:$0xff]  ;;  %s542_s26 = sshll.u32 %s884_s25, 3  ;;  %s289_s27 = scalar_lea.vmem [#allocation10], %s536_s13 }
  0x38   : > { %329 = vmatpush.msra.mxu0 %v321_v0  ;;  %v317_v2 = vld [vmem:[#allocation5 + $0xd0] sm:$0xff]  ;;  %v315_v3 = vld [vmem:[#allocation5 + $0xc0] sm:$0xff]  ;;  %v322_v7 = vld [vmem:[#allocation5 + $0xf8] sm:$0xff]  ;;  %s423_s22 = scalar_lea.hbm %s1031_s5, %s542_s26  ;;  %s425_s28 = sshll.u32 %s289_s27, 4  ;;  %s426_s28 = int_to_ptr.vmem [resolvable:$true] %s425_s28 }
  0x39   : > { %v385_v4 = vld [vmem:[#allocation8 + $0x78] sm:$0xff]  ;;  %v313_v5 = vld [vmem:[#allocation5 + $0xb0] sm:$0xff]  ;;  %349 = vmatpush.msra.mxu1 %v322_v7  ;;  %v320_v9 = vld [vmem:[#allocation5 + $0xe8] sm:$0xff]  ;;  %s427_s10 = sshll.u32 %s423_s22, 4  ;;  %s413_s25 = scalar_lea.sflag [#allocation4], %s967_s7  ;;  %s428_s10 = int_to_ptr.hbm [resolvable:$true] %s427_s10 }
  0x3a   : > { %330 = vmatpush.msra.mxu0 %v319_v1  ;;  %390 = vmatpush.msra.mxu2 %v385_v4  ;;  %v384_v6 = vld [vmem:[#allocation8 + $0x70] sm:$0xff]  ;;  %v383_v8 = vld [vmem:[#allocation8 + $0x68] sm:$0xff]  ;;  %v311_v10 = vld [vmem:[#allocation5 + $0xa0] sm:$0xff]  ;;  %s761_s9 = sshra.s32 %s428_s10, 4  ;;  %s762_s9 = int_to_ptr.hbm [resolvable:$true] %s761_s9 }
  0x3b   : > { %v318_v11 = vld [vmem:[#allocation5 + $0xd8] sm:$0xff]  ;;  %v382_v12 = vld [vmem:[#allocation8 + $0x60] sm:$0xff]  ;;  %350 = vmatpush.msra.mxu1 %v320_v9  ;;  %v309_v13 = vld [vmem:[#allocation5 + $0x90] sm:$0xff]  ;;  %s763_s11 = scalar_lea.hbm %s762_s9, 8  ;;  %p768_p12 = scmp.lt.s32.totalorder %s762_s9, %s1031_s5 }
  0x3c   : > { %331 = vmatpush.msra.mxu0 %v317_v2  ;;  %391 = vmatpush.msra.mxu2 %v384_v6  ;;  %v316_v14 = vld [vmem:[#allocation5 + $0xc8] sm:$0xff]  ;;  %v381_v15 = vld [vmem:[#allocation8 + $0x58] sm:$0xff]  ;;  %v380_v18 = vld [vmem:[#allocation8 + $0x50] sm:$0xff]  ;;  %p764_p1 = scmp.ne.s32.totalorder %s762_s9, %s763_s11 }
  0x3d   : > { %351 = vmatpush.msra.mxu1 %v318_v11  ;;  %v307_v16 = vld [vmem:[#allocation5 + $0x80] sm:$0xff]  ;;  %v314_v17 = vld [vmem:[#allocation5 + $0xb8] sm:$0xff]  ;;  %v305_v19 = vld [vmem:[#allocation5 + $0x70] sm:$0xff] }
  0x3e   : > { %332 = vmatpush.msra.mxu0 %v315_v3  ;;  %392 = vmatpush.msra.mxu2 %v383_v8  ;;  %v312_v20 = vld [vmem:[#allocation5 + $0xa8] sm:$0xff]  ;;  %v303_v22 = vld [vmem:[#allocation5 + $0x60] sm:$0xff]  ;;  %v310_v23 = vld [vmem:[#allocation5 + $0x98] sm:$0xff]  ;;  %p765_p3 = pnand %p764_p1, %p936_p13 }
  0x3f   : > { %352 = vmatpush.msra.mxu1 %v316_v14  ;;  %v379_v21 = vld [vmem:[#allocation8 + $0x48] sm:$0xff]  ;;  %v378_v24 = vld [vmem:[#allocation8 + $0x40] sm:$0xff]  ;;  %v377_v27 = vld [vmem:[#allocation8 + $0x38] sm:$0xff] }
  0x40   : > { %333 = vmatpush.msra.mxu0 %v313_v5  ;;  %393 = vmatpush.msra.mxu2 %v382_v12  ;;  %v301_v25 = vld [vmem:[#allocation5 + $0x50] sm:$0xff]  ;;  %v308_v26 = vld [vmem:[#allocation5 + $0x88] sm:$0xff]  ;;  %v299_v28 = vld [vmem:[#allocation5 + $0x40] sm:$0xff]  ;;  %p766_p5 = pneg %p765_p3 }
  0x41   : > { %353 = vmatpush.msra.mxu1 %v314_v17  ;;  %v306_v29 = vld [vmem:[#allocation5 + $0x78] sm:$0xff]  ;;  %v297_v31 = vld [vmem:[#allocation5 + $0x30] sm:$0xff]  ;;  %v304_v32 = vld [vmem:[#allocation5 + $0x68] sm:$0xff] }
  0x42   : > { %334 = vmatpush.msra.mxu0 %v311_v10  ;;  %394 = vmatpush.msra.mxu2 %v381_v15  ;;  %v376_v30 = vld [vmem:[#allocation8 + $0x30] sm:$0xff]  ;;  %v375_v33 = vld [vmem:[#allocation8 + $0x28] sm:$0xff]  ;;  %v295_v34 = vld [vmem:[#allocation5 + $0x20] sm:$0xff] }
  0x43   : > { %354 = vmatpush.msra.mxu1 %v312_v20  ;;  %v374_v35 = vld [vmem:[#allocation8 + $0x20] sm:$0xff]  ;;  %v293_v36 = vld [vmem:[#allocation5 + $0x10] sm:$0xff]  ;;  %v373_v37 = vld [vmem:[#allocation8 + $0x18] sm:$0xff] }
  0x44   : > { %335 = vmatpush.msra.mxu0 %v309_v13  ;;  %395 = vmatpush.msra.mxu2 %v380_v18  ;;  %v291_v38 = vld [vmem:[#allocation5] sm:$0xff]  ;;  %v290_v39 = vld [vmem:[%s973_s23] sm:$0xff]  ;;  %v300_v42 = vld [vmem:[#allocation5 + $0x48] sm:$0xff]  ;;  %s767_s23 = scalar_lea.hbm %s1031_s5, 16 }
  0x45   : > { %355 = vmatpush.msra.mxu1 %v310_v23  ;;  %v302_v40 = vld [vmem:[#allocation5 + $0x58] sm:$0xff]  ;;  %v371_v43 = vld [vmem:[#allocation8 + $0x8] sm:$0xff]  ;;  %v370_v45 = vld [vmem:[#allocation8] sm:$0xff]  ;;  %p769_p8 = scmp.lt.s32.totalorder %s767_s23, %s763_s11 }
  0x46   : > { %336 = vmatpush.msra.mxu0 %v307_v16  ;;  %396 = vmatpush.msra.mxu2 %v379_v21  ;;  %v372_v41 = vld [vmem:[#allocation8 + $0x10] sm:$0xff]  ;;  %v296_v46 = vld [vmem:[#allocation5 + $0x28] sm:$0xff]  ;;  %v323_v49 = vld [vmem:[#allocation7] sm:$0x3] }
  0x47   : > { %356 = vmatpush.msra.mxu1 %v308_v26  ;;  %v298_v44 = vld [vmem:[#allocation5 + $0x38] sm:$0xff]  ;;  %v292_v48 = vld [vmem:[#allocation5 + $0x8] sm:$0xff]  ;;  %v325_v50 = vperm.slane %v323_v49, 0  ;;  %v326_v54 = vperm.slane %v323_v49, 1  ;;  %v626_v56 = vld [vmem:[%s1030_s4] ss:$0 sm:$0xff]  ;;  %p770_p7 = por %p769_p8, %p768_p12 }
  0x48   : > { %337 = vmatpush.msra.mxu0 %v305_v19  ;;  %397 = vmatpush.msra.mxu2 %v378_v24  ;;  %v294_v47 = vld [vmem:[#allocation5 + $0x18] sm:$0xff] }
  0x49   : > { %357 = vmatpush.msra.mxu1 %v306_v29  ;;  %p771_p9 = pnand %p770_p7, %p766_p5 }
  0x4a   : > { %338 = vmatpush.msra.mxu0 %v303_v22  ;;  %398 = vmatpush.msra.mxu2 %v377_v27 }
  0x4b   : > { %358 = vmatpush.msra.mxu1 %v304_v32 }
  0x4c   : > { %339 = vmatpush.msra.mxu0 %v301_v25  ;;  %399 = vmatpush.msra.mxu2 %v376_v30 }
  0x4d   : > { %359 = vmatpush.msra.mxu1 %v302_v40 }
  0x4e   : > { %340 = vmatpush.msra.mxu0 %v299_v28  ;;  %400 = vmatpush.msra.mxu2 %v375_v33 }
  0x4f   : > { %360 = vmatpush.msra.mxu1 %v300_v42 }
  0x50   : > { %341 = vmatpush.msra.mxu0 %v297_v31  ;;  %401 = vmatpush.msra.mxu2 %v374_v35 }
  0x51   : > { %361 = vmatpush.msra.mxu1 %v298_v44 }
  0x52   : > { %342 = vmatpush.msra.mxu0 %v295_v34  ;;  %402 = vmatpush.msra.mxu2 %v373_v37 }
  0x53   : > { %362 = vmatpush.msra.mxu1 %v296_v46 }
  0x54   : > { %343 = vmatpush.msra.mxu0 %v293_v36  ;;  %403 = vmatpush.msra.mxu2 %v372_v41 }
  0x55   : > { %363 = vmatpush.msra.mxu1 %v294_v47 }
  0x56   : > { %344 = vmatpush.msra.mxu0 %v291_v38  ;;  %404 = vmatpush.msra.mxu2 %v371_v43 }
  0x57   : > { %345 = vmatmul.f32.vlgmr.msra.gmra.mxu0 %v290_v39  ;;  %364 = vmatpush.msra.mxu1 %v292_v48 }
  0x58   : > { %405 = vmatpush.msra.mxu2 %v370_v45  ;;  %365 = vmatmul.f32.vlgmr.msra.gmra.mxu1 %v290_v39 }
  0xd4   : > { %v346_v51 = vpop.f32.mrf.mxu0 }
  0xd5   : > { %v347_v52 = vadd.f32 %v346_v51, %v325_v50  ;;  %v366_v55 = vpop.f32.mrf.mxu1 }
  0xd6   : > { %v367_v57 = vadd.f32 %v366_v55, %v326_v54 }
  0xd7   : > { %v369_v53 = vmax.f32 %v347_v52, 0.0 }
  0xd9   : > { %406 = vmatmul.f32.vlgmr.msra.gmra.mxu2 %v369_v53 }
 0x15c   : > { %v407_v58 = vpop.f32.mrf.mxu2 }
 0x15d   : > { %v408_v59 = vadd.f32 %v626_v56, %v407_v58 }
 0x15f   : > { %v410_v60 = vmul.f32 %v408_v59, %v367_v57 }
 0x161   : > { %411 = vst [vmem:[%s289_s27] sm:$0xff] %v410_v60 }
 0x162   : > { %774 = shalt.err (!%p771_p9)
}
 0x163   : > { %559 = dma.vmem_to_hbm [thread:$0]  (%p936_p13), %s426_s28, 128, %s428_s10, %s413_s25  }
 0x164 PF: > { %s439_s7 = sand.u32 1, %s809_s18   ;;  %p1038_p10 = scmp.ge.s32.totalorder %s821_s21, 2 }
 0x165   : > { %s440_s30 = scalar_lea.sflag [#allocation4], %s439_s7 }
 0x166   : > { %p576_p11 = pnand %p1038_p10, %p941_p4 }
 0x168   : > { %p577_p0 = pneg %p576_p11 }
 0x16a   : > { %804 = dma.done.wait (%p577_p0), %s440_s30, 128  }
 0x16b   : > { %806 = vsyncadd (%p577_p0), %s440_s30, 4294967168  ;;  %p20_p2 = scmp.ge.s32.totalorder %s916_s24, 4   ;;  %s1039_s18 = smov %s813_s19 }
 0x16c   : > { %s1040_s19 = smov %s817_s20  ;;  %s1041_s20 = smov %s928_s29 }
 0x16d   : > { %s1042_s21 = smov %s916_s24  ;;  %22 = sbr.rel (!%p20_p2) target bundleno = 7 (0x7), region = 97 }
 0x172   :  { %446 = vsyncpa [#allocation3], 1 }
 0x173   :  { %448 = vsyncpa [#allocation3 + $0x1], 1 }
 0x174   :  { %449 = vsyncpa [#allocation6], 1 }
 0x175   :  { %450 = vsyncpa [#allocation9], 1 }
 0x176   :  { %451 = vsyncpa [#allocation4], 1 }
 0x177   :  { %453 = vsyncpa [#allocation4 + $0x1], 1 }

</bundles_post_ra>
